<compile_context>
chip_gen: v5e
topology: v5e:2x2
jax: 0.10.0
libtpu: 0.0.40
codegen_flags: <defaults>
</compile_context>

<pallas_src>
import functools
import math

import jax
import jax.numpy as jnp
from jax.experimental import pallas as pl
from jax.experimental.pallas import tpu as pltpu


# Scoped-VMEM budget: safe on v5e/v6e (128 MiB physical) and v7x (64 MiB).
_VMEM_LIMIT = 32 * 1024 * 1024
_TRY_LANE_DENSE = True


# ---------------------------------------------------------------------------
# Kernels
# ---------------------------------------------------------------------------
def _transpose2d_kernel(x_ref, o_ref):
    # x_ref: (tm, tn) -> o_ref: (tn, tm).  2-D transpose lowers to XLU work,
    # which is off the load/store critical path of this mem-bound kernel.
    o_ref[...] = x_ref[...].T


def _transpose2d_flat_kernel(x_ref, o_ref):
    # x_ref: (M, tn); o_ref: (tn*M//128, 128) = row-major flat image of x.T.
    # Presenting the output as a (rows, 128) slab makes every store lane-dense.
    o_ref[...] = x_ref[...].T.reshape(o_ref.shape)


def _permute_kernel(x_ref, o_ref, *, perm):
    o_ref[...] = jnp.transpose(x_ref[...], perm)


# ---------------------------------------------------------------------------
# Helpers
# ---------------------------------------------------------------------------
def _canonicalize(shape, dims):
    """Drop size-1 axes and merge adjacent axes that stay adjacent.

    Element order of the merged input/output views matches the original
    input / permuted output, so wrapper-side reshapes around the kernel are
    free (pure metadata).
    """
    nd = len(shape)
    keep = [a for a in range(nd) if shape[a] != 1]
    if not keep:
        return (), ()
    remap = {a: i for i, a in enumerate(keep)}
    shp = [shape[a] for a in keep]
    perm = [remap[d] for d in dims if shape[d] != 1]

    pos = {ax: i for i, ax in enumerate(perm)}
    groups = [[0]]
    for a in range(1, len(shp)):
        if pos[a] == pos[a - 1] + 1:
            groups[-1].append(a)
        else:
            groups.append([a])
    gid = {}
    for gi, g in enumerate(groups):
        for a in g:
            gid[a] = gi
    m_shape = tuple(int(math.prod(shp[a] for a in g)) for g in groups)
    m_perm = []
    for d in perm:
        g = gid[d]
        if not m_perm or m_perm[-1] != g:
            m_perm.append(g)
    return m_shape, tuple(m_perm)


def _pick_tile(dim, cap=512):
    """Largest multiple of 128 that divides `dim` and is <= cap, else `dim`.

    A multiple of 128 satisfies both the lane (128) and sublane (8/16/32)
    alignment requirement on whichever side of the transpose it lands; the
    full extent is always a legal block dim.
    """
    t = (min(cap, dim) // 128) * 128
    while t >= 128:
        if dim % t == 0:
            return t
        t -= 128
    return dim


# ---------------------------------------------------------------------------
# Optimized path: batched 2-D transpose  (B, M, N) -> (B, N, M)
# ---------------------------------------------------------------------------
def _batched_transpose(x3):
    B, M, N = map(int, x3.shape)
    dtype = x3.dtype
    itemsize = dtype.itemsize
    sub = max(8, 32 // itemsize)          # sublane multiple: 8/16/32 by dtype

    tm = _pick_tile(M)
    tn = _pick_tile(N)

    cost = pl.CostEstimate(flops=0, transcendentals=0,
                           bytes_accessed=2 * x3.size * itemsize)

    # ---- lane-dense output variant (output minor dim < 128) ---------------
    rows = (tn * M) // 128
    lane_dense_ok = (
        _TRY_LANE_DENSE
        and tm == M and M < 128
        and (tn * M) % 128 == 0
        and (rows % sub == 0 or tn == N)
    )
    if lane_dense_ok:
        try:
            out_flat = pl.pallas_call(
                _transpose2d_flat_kernel,
                out_shape=jax.ShapeDtypeStruct((B, (N * M) // 128, 128), dtype),
                grid_spec=pltpu.PrefetchScalarGridSpec(
                    num_scalar_prefetch=0,
                    grid=(B, N // tn),
                    in_specs=[pl.BlockSpec((pl.Squeezed(), M, tn),
                                           lambda b, j: (b, 0, j))],
                    out_specs=pl.BlockSpec((pl.Squeezed(), rows, 128),
                                           lambda b, j: (b, j, 0)),
                ),
                compiler_params=pltpu.CompilerParams(
                    dimension_semantics=("parallel", "parallel"),
                    vmem_limit_bytes=_VMEM_LIMIT),
                cost_estimate=cost,
            )(x3)
            return out_flat.reshape(B, N, M)
        except Exception:
            # Mosaic could not lower the in-register relayout for this shape /
            # dtype; fall back to the plain (tn, tm) output layout below.
            pass

    # ---- standard tiled variant -------------------------------------------
    return pl.pallas_call(
        _transpose2d_kernel,
        out_shape=jax.ShapeDtypeStruct((B, N, M), dtype),
        grid_spec=pltpu.PrefetchScalarGridSpec(
            num_scalar_prefetch=0,
            grid=(B, M // tm, N // tn),
            in_specs=[pl.BlockSpec((pl.Squeezed(), tm, tn),
                                   lambda b, i, j: (b, i, j))],
            out_specs=pl.BlockSpec((pl.Squeezed(), tn, tm),
                                   lambda b, i, j: (b, j, i)),
        ),
        compiler_params=pltpu.CompilerParams(
            dimension_semantics=("parallel", "parallel", "parallel"),
            vmem_limit_bytes=_VMEM_LIMIT),
        cost_estimate=cost,
    )(x3)


# ---------------------------------------------------------------------------
# Generic fallback for interleaved (>2-group) permutations
# ---------------------------------------------------------------------------
def _generic_permute(x, perm, out_shape):
    nd = x.ndim
    if perm[0] == 0 and x.shape[0] > 1 and nd >= 3:
        slab_perm = tuple(d - 1 for d in perm[1:])
        return pl.pallas_call(
            functools.partial(_permute_kernel, perm=slab_perm),
            out_shape=jax.ShapeDtypeStruct(out_shape, x.dtype),
            grid_spec=pltpu.PrefetchScalarGridSpec(
                num_scalar_prefetch=0,
                grid=(x.shape[0],),
                in_specs=[pl.BlockSpec((pl.Squeezed(),) + tuple(x.shape[1:]),
                                       lambda b: (b,) + (0,) * (nd - 1))],
                out_specs=pl.BlockSpec((pl.Squeezed(),) + tuple(out_shape[1:]),
                                       lambda b: (b,) + (0,) * (nd - 1)),
            ),
            compiler_params=pltpu.CompilerParams(
                dimension_semantics=("parallel",),
                vmem_limit_bytes=_VMEM_LIMIT),
        )(x)
    # TODO(synk): very large interleaved permutations land here as a single
    # whole-array VMEM block; decompose into multiple 2-D transpose passes if
    # such shapes ever exceed the scoped-VMEM budget.
    return pl.pallas_call(
        functools.partial(_permute_kernel, perm=perm),
        out_shape=jax.ShapeDtypeStruct(out_shape, x.dtype),
        in_specs=[pl.BlockSpec(memory_space=pltpu.MemorySpace.VMEM)],
        out_specs=pl.BlockSpec(memory_space=pltpu.MemorySpace.VMEM),
        compiler_params=pltpu.CompilerParams(vmem_limit_bytes=_VMEM_LIMIT),
    )(x)


# ---------------------------------------------------------------------------
# Public wrapper: torch.Tensor.permute(dims) equivalent
# ---------------------------------------------------------------------------
def permute_pallas(x, dims):
    ndim = x.ndim
    dims = tuple(int(d) % ndim for d in dims) if ndim else tuple(dims)
    assert len(dims) == ndim and sorted(dims) == list(range(ndim)), dims
    out_shape = tuple(x.shape[d] for d in dims)
    if ndim <= 1:
        return x

    m_shape, m_perm = _canonicalize(x.shape, dims)

    # Identity (possibly after dropping moved size-1 axes): memory order is
    # unchanged, a metadata reshape reproduces the permuted shape.
    if len(m_perm) <= 1 or m_perm == tuple(range(len(m_perm))):
        return x.reshape(out_shape)

    # Batched 2-D transpose: any permutation that only swaps two adjacent
    # merged groups (e.g. NCHW->NHWC, NHWC->NCHW) reduces to this.
    if m_perm == (1, 0) or m_perm == (0, 2, 1):
        if m_perm == (1, 0):
            B, M, N = 1, m_shape[0], m_shape[1]
        else:
            B, M, N = m_shape
        y = _batched_transpose(x.reshape(B, M, N))
        return y.reshape(out_shape)

    # Genuinely interleaved permutation (rare): slab-per-grid-step fallback.
    m_out = tuple(m_shape[p] for p in m_perm)
    y = _generic_permute(x.reshape(m_shape), m_perm, m_out)
    return y.reshape(out_shape)


if __name__ == "__main__":
    key = jax.random.PRNGKey(0)
    # NCHW input, as the PyTorch module would receive from a conv stack.
    x = jax.random.normal(key, (2, 4, 16, 16), dtype=jnp.float32)
    dims = (0, 2, 3, 1)  # NCHW -> NHWC, typical usage of Permute

    out = jax.block_until_ready(permute_pallas(x, dims))

    # Verify against plain JAX transpose (same semantics as torch.permute).
    ref = jnp.transpose(x, dims)
    assert out.shape == ref.shape, (out.shape, ref.shape)
    assert out.dtype == ref.dtype
    assert bool(jnp.array_equal(out, ref))

    print("KERNEL_OK")
</pallas_src>

<mosaic_0001>
module attributes {stable_mosaic.version = 11 : i64} {
  func.func @_transpose2d_flat_kernel(%arg0: i32, %arg1: i32, %arg2: memref<1x4x256xf32, #tpu.memory_space<vmem>>, %arg3: memref<1x8x128xf32, #tpu.memory_space<vmem>>) attributes {dimension_semantics = [#tpu.dimension_semantics<parallel>, #tpu.dimension_semantics<parallel>], iteration_bounds = array<i64: 2, 1>, scalar_prefetch = 0 : i64, scratch_operands = 0 : i64, tpu.core_type = #tpu.core_type<tc>, window_params = [{transform_indices = @transform_0, window_bounds = array<i64: 1, 4, 256>}, {transform_indices = @transform_1, window_bounds = array<i64: 1, 8, 128>}]} {
    %c0 = arith.constant 0 : index
    %c0_0 = arith.constant 0 : index
    %c0_1 = arith.constant 0 : index
    %0 = vector.load %arg2[%c0, %c0_0, %c0_1] : memref<1x4x256xf32, #tpu.memory_space<vmem>>, vector<1x4x256xf32>
    %1 = vector.shape_cast %0 : vector<1x4x256xf32> to vector<4x256xf32>
    %2 = tpu.transpose %1, [1, 0] : vector<4x256xf32> -> vector<256x4xf32>
    %3 = vector.shape_cast %2 : vector<256x4xf32> to vector<8x128xf32>
    %c0_2 = arith.constant 0 : index
    %c0_3 = arith.constant 0 : index
    %c0_4 = arith.constant 0 : index
    %4 = vector.load %arg3[%c0_2, %c0_3, %c0_4] : memref<1x8x128xf32, #tpu.memory_space<vmem>>, vector<1x8x128xf32>
    %5 = vector.shape_cast %4 : vector<1x8x128xf32> to vector<8x128xf32>
    %6 = vector.shape_cast %3 : vector<8x128xf32> to vector<1x8x128xf32>
    tpu.vector_store %arg3[%c0_2, %c0_3, %c0_4], %6 {strides = array<i32>} : memref<1x8x128xf32, #tpu.memory_space<vmem>>, vector<1x8x128xf32>,
    return
  }
  func.func @transform_0(%arg0: i32, %arg1: i32) -> (i32, i32, i32) {
    %c0_i32 = arith.constant 0 : i32
    %c0_i32_0 = arith.constant 0 : i32
    return %arg0, %c0_i32, %arg1 : i32, i32, i32
  }
  func.func @transform_1(%arg0: i32, %arg1: i32) -> (i32, i32, i32) {
    %c0_i32 = arith.constant 0 : i32
    %c0_i32_0 = arith.constant 0 : i32
    return %arg0, %arg1, %c0_i32 : i32, i32, i32
  }
}

module attributes {stable_mosaic.version = 11 : i64} {
  func.func @_transpose2d_kernel(%arg0: i32, %arg1: i32, %arg2: i32, %arg3: memref<1x4x256xf32, #tpu.memory_space<vmem>>, %arg4: memref<1x256x4xf32, #tpu.memory_space<vmem>>) attributes {dimension_semantics = [#tpu.dimension_semantics<parallel>, #tpu.dimension_semantics<parallel>, #tpu.dimension_semantics<parallel>], iteration_bounds = array<i64: 2, 1, 1>, scalar_prefetch = 0 : i64, scratch_operands = 0 : i64, tpu.core_type = #tpu.core_type<tc>, window_params = [{transform_indices = @transform_0, window_bounds = array<i64: 1, 4, 256>}, {transform_indices = @transform_1, window_bounds = array<i64: 1, 256, 4>}]} {
    %c0 = arith.constant 0 : index
    %c0_0 = arith.constant 0 : index
    %c0_1 = arith.constant 0 : index
    %0 = vector.load %arg3[%c0, %c0_0, %c0_1] : memref<1x4x256xf32, #tpu.memory_space<vmem>>, vector<1x4x256xf32>
    %1 = vector.shape_cast %0 : vector<1x4x256xf32> to vector<4x256xf32>
    %2 = tpu.transpose %1, [1, 0] : vector<4x256xf32> -> vector<256x4xf32>
    %c0_2 = arith.constant 0 : index
    %c0_3 = arith.constant 0 : index
    %c0_4 = arith.constant 0 : index
    %3 = vector.load %arg4[%c0_2, %c0_3, %c0_4] : memref<1x256x4xf32, #tpu.memory_space<vmem>>, vector<1x256x4xf32>
    %4 = vector.shape_cast %3 : vector<1x256x4xf32> to vector<256x4xf32>
    %5 = vector.shape_cast %2 : vector<256x4xf32> to vector<1x256x4xf32>
    tpu.vector_store %arg4[%c0_2, %c0_3, %c0_4], %5 {strides = array<i32>} : memref<1x256x4xf32, #tpu.memory_space<vmem>>, vector<1x256x4xf32>,
    return
  }
  func.func @transform_0(%arg0: i32, %arg1: i32, %arg2: i32) -> (i32, i32, i32) {
    %c0_i32 = arith.constant 0 : i32
    return %arg0, %arg1, %arg2 : i32, i32, i32
  }
  func.func @transform_1(%arg0: i32, %arg1: i32, %arg2: i32) -> (i32, i32, i32) {
    %c0_i32 = arith.constant 0 : i32
    return %arg0, %arg2, %arg1 : i32, i32, i32
  }
}

</mosaic_0001>

<bundles_post_ra>
// kernel: tpu_custom_call.1
= control target key start
LH: loop header
LB: loop body
LE: loop exit
PB: predicated region body
PF: predicated region fallthrough
CT: control target
= control target key end

     0   :  { %6 = vsyncpa [#allocation3], 0  ;;  %s715_s0 = inlined_call_operand.hbm [shape: f32[2,4,256], index: 0, kind: input, shape index: {}]   ;;  %s716_s1 = inlined_call_operand.vmem [shape: f32[2,256,4], index: 1, kind: output, shape index: {}]  }
   0x1   :  { %8 = vsyncpa [#allocation3 + $0x1], 0  ;;  %s561_s6 = smov 0   ;;  %s563_s7 = smov 0  }
   0x2   :  { %s565_s8 = smov 0   ;;  %s567_s9 = smov 0  }
   0x3   :  { %s569_s10 = smov 0   ;;  %s571_s11 = smov 0  }
   0x4 LB: > { %s398_s12 = sadd.s32 4294967295, %s549_s11   ;;  %s33_s13 = sadd.s32 1, %s545_s10  ;;  %s549_s11 = sphi %s571_s11, %s14_s11   ;;  %s545_s10 = sphi %s569_s10, %s723_s10   ;;  %s541_s9 = sphi %s567_s9, %s722_s9   ;;  %s537_s8 = sphi %s565_s8, %s721_s8   ;;  %s533_s7 = sphi %s563_s7, %s720_s7   ;;  %s529_s6 = sphi %s561_s6, %s719_s6  }
   0x5   : > { %p35_p0 = scmp.ge.s32.totalorder %s33_s13, 2  ;;  %s44_s14 = sadd.s32 1, %s537_s8 }
   0x6   : > { %p51_p1 = scmp.ne.s32.totalorder %s537_s8, %s533_s7  ;;  %p52_p2 = scmp.eq.s32.totalorder %s549_s11, 0 }
   0x7   : > { %s725_s13 = smov (%p35_p0, %s33_s13), 0  ;;  %p57_p4 = scmp.ne.s32.totalorder %s533_s7, %s529_s6 }
   0x8   : > { %p597_p3 = por %p52_p2, %p51_p1  ;;  %s37_s16 = ssub.s32 %s545_s10, %s725_s13 }
   0x9   : > { %p58_p5 = scmp.eq.s32.totalorder %s398_s12, 0  ;;  %p42_p6 = scmp.eq.s32.totalorder %s37_s16, 0 }
   0xa   : > { %p419_p8 = scmp.lt.s32.totalorder %s549_s11, 2  ;;  %s111_s19 = sand.u32 1, %s537_s8  }
   0xb   : > { %p604_p7 = por %p58_p5, %p57_p4  ;;  %s411_s20 = sshll.u32 %s545_s10, 3 }
   0xc   : > { %s610_s18 = scalar_select %p42_p6, %s537_s8, %s44_s14  }
   0xd   : > { %s402_s21 = sshll.u32 %s111_s19, 3  ;;  %s124_s24 = scalar_lea.hbm %s715_s0, %s411_s20 }
   0xe   : > { %s126_s25 = sshll.u32 %s124_s24, 4  ;;  %s115_s26 = scalar_lea.vmem [#allocation2], %s402_s21  ;;  %s127_s25 = int_to_ptr.hbm [resolvable:$true] %s126_s25 }
   0xf   : > { %s128_s27 = sshll.u32 %s115_s26, 4  ;;  %p416_p9 = pnand %p419_p8, %p597_p3  ;;  %s129_s27 = int_to_ptr.vmem [resolvable:$true] %s128_s27 }
  0x10   : > { %p405_p10 = scmp.ge.s32.totalorder %s549_s11, 1  ;;  %p133_p11 = scmp.lt.s32.totalorder %s549_s11, 3 }
  0x11   : > { %s112_s28 = scalar_lea.sflag [#allocation3], %s111_s19 }
  0x12   : > { %418 = dma.hbm_to_vmem [thread:$0]  (!%p416_p9), %s127_s25, 128, %s129_s27, %s112_s28  }
  0x13   : > { %p134_p12 = pnand %p405_p10, %p133_p11 }
  0x14   : > { %s139_s29 = sand.u32 (!%p134_p12), 1, %s533_s7  }
  0x15   : > { %137 = sbr.rel (%p134_p12) target bundleno = 450 (0x1c2), region = 24  ;;  %s406_s30 = sshll.u32 (!%p134_p12), %s139_s29, 3 }
  0x16   : > { %s140_s2 = scalar_lea.sflag (!%p134_p12), [#allocation3], %s139_s29  ;;  %s143_s3 = scalar_lea.vmem (!%p134_p12), [#allocation2], %s406_s30 }
  0x1a   : > { %524 = dma.done.wait (%p604_p7), %s140_s2, 128  }
  0x1b   : > { %526 = vsyncadd (%p604_p7), %s140_s2, 4294967168  ;;  %v184_v0 = vld [vmem:[%s143_s3] sm:$0xff]  ;;  %p172_p13 = scmp.lt.s32.totalorder %s541_s9, 1  ;;  %vm255_vm0 = vcmask 31744  }
  0x1c   : > { %186 = vst [vmem:[#allocation1] ss:$2 sm:$0xff] %v184_v0 }
  0x1d   : > { %s727_s9 = smov (!%p172_p13, %s541_s9), 1 }
  0x1e   : > { %s412_s4 = sshll.u32 %s727_s9, 8 }
  0x1f   : > { %s631_s12 = scalar_lea.vmem %s716_s1, %s412_s4 }
  0x23   : > { %v187_v1 = vld.sshfl [vmem:[#allocation1] sm:$0xff pattern:$0x75316420]  ;;  %v188_v2 = vld.sshfl [vmem:[#allocation1 + $0x8] sm:$0xff pattern:$0x75316420] }
  0x24   : > { %191 = vxpose.xlu0.b32.start.end [1/1] (short) %v187_v1, 128 }
  0xa4   : > { %223 = vxpose.xlu0.b32.start.end [1/1] (short) %v188_v2, 128 }
  0xc8   : > { %v207_v3 = vpop.trf.xlu0 }
  0xc9   : > { %256 = vst.msk [vmem:[%s631_s12] sm:$0xff] %vm255_vm0, %v207_v3 }
  0xd0   : > { %v208_v4 = vpop.trf.xlu0 }
  0xd1   : > { %257 = vst.msk [vmem:[%s631_s12 + $0x8] sm:$0xff] %vm255_vm0, %v208_v4 }
  0xd8   : > { %v209_v5 = vpop.trf.xlu0 }
  0xd9   : > { %258 = vst.msk [vmem:[%s631_s12 + $0x10] sm:$0xff] %vm255_vm0, %v209_v5 }
  0xe0   : > { %v210_v6 = vpop.trf.xlu0 }
  0xe1   : > { %259 = vst.msk [vmem:[%s631_s12 + $0x18] sm:$0xff] %vm255_vm0, %v210_v6 }
  0xe8   : > { %v211_v7 = vpop.trf.xlu0 }
  0xe9   : > { %260 = vst.msk [vmem:[%s631_s12 + $0x20] sm:$0xff] %vm255_vm0, %v211_v7 }
  0xf0   : > { %v212_v8 = vpop.trf.xlu0 }
  0xf1   : > { %261 = vst.msk [vmem:[%s631_s12 + $0x28] sm:$0xff] %vm255_vm0, %v212_v8 }
  0xf8   : > { %v213_v9 = vpop.trf.xlu0 }
  0xf9   : > { %262 = vst.msk [vmem:[%s631_s12 + $0x30] sm:$0xff] %vm255_vm0, %v213_v9 }
 0x100   : > { %v214_v10 = vpop.trf.xlu0 }
 0x101   : > { %263 = vst.msk [vmem:[%s631_s12 + $0x38] sm:$0xff] %vm255_vm0, %v214_v10 }
 0x108   : > { %v215_v11 = vpop.trf.xlu0 }
 0x109   : > { %264 = vst.msk [vmem:[%s631_s12 + $0x40] sm:$0xff] %vm255_vm0, %v215_v11 }
 0x110   : > { %v216_v12 = vpop.trf.xlu0 }
 0x111   : > { %265 = vst.msk [vmem:[%s631_s12 + $0x48] sm:$0xff] %vm255_vm0, %v216_v12 }
 0x118   : > { %v217_v13 = vpop.trf.xlu0 }
 0x119   : > { %266 = vst.msk [vmem:[%s631_s12 + $0x50] sm:$0xff] %vm255_vm0, %v217_v13 }
 0x120   : > { %v218_v14 = vpop.trf.xlu0 }
 0x121   : > { %267 = vst.msk [vmem:[%s631_s12 + $0x58] sm:$0xff] %vm255_vm0, %v218_v14 }
 0x128   : > { %v219_v15 = vpop.trf.xlu0 }
 0x129   : > { %268 = vst.msk [vmem:[%s631_s12 + $0x60] sm:$0xff] %vm255_vm0, %v219_v15 }
 0x130   : > { %v220_v16 = vpop.trf.xlu0 }
 0x131   : > { %269 = vst.msk [vmem:[%s631_s12 + $0x68] sm:$0xff] %vm255_vm0, %v220_v16 }
 0x138   : > { %v221_v17 = vpop.trf.xlu0 }
 0x139   : > { %270 = vst.msk [vmem:[%s631_s12 + $0x70] sm:$0xff] %vm255_vm0, %v221_v17 }
 0x140   : > { %v222_v18 = vpop.trf.xlu0 }
 0x141   : > { %271 = vst.msk [vmem:[%s631_s12 + $0x78] sm:$0xff] %vm255_vm0, %v222_v18 }
 0x148   : > { %v239_v19 = vpop.trf.xlu0 }
 0x149   : > { %272 = vst.msk [vmem:[%s631_s12 + $0x80] sm:$0xff] %vm255_vm0, %v239_v19 }
 0x150   : > { %v240_v20 = vpop.trf.xlu0 }
 0x151   : > { %273 = vst.msk [vmem:[%s631_s12 + $0x88] sm:$0xff] %vm255_vm0, %v240_v20 }
 0x158   : > { %v241_v21 = vpop.trf.xlu0 }
 0x159   : > { %274 = vst.msk [vmem:[%s631_s12 + $0x90] sm:$0xff] %vm255_vm0, %v241_v21 }
 0x160   : > { %v242_v22 = vpop.trf.xlu0 }
 0x161   : > { %275 = vst.msk [vmem:[%s631_s12 + $0x98] sm:$0xff] %vm255_vm0, %v242_v22 }
 0x168   : > { %v243_v23 = vpop.trf.xlu0 }
 0x169   : > { %276 = vst.msk [vmem:[%s631_s12 + $0xa0] sm:$0xff] %vm255_vm0, %v243_v23 }
 0x170   : > { %v244_v24 = vpop.trf.xlu0 }
 0x171   : > { %277 = vst.msk [vmem:[%s631_s12 + $0xa8] sm:$0xff] %vm255_vm0, %v244_v24 }
 0x178   : > { %v245_v25 = vpop.trf.xlu0 }
 0x179   : > { %278 = vst.msk [vmem:[%s631_s12 + $0xb0] sm:$0xff] %vm255_vm0, %v245_v25 }
 0x180   : > { %v246_v26 = vpop.trf.xlu0 }
 0x181   : > { %279 = vst.msk [vmem:[%s631_s12 + $0xb8] sm:$0xff] %vm255_vm0, %v246_v26 }
 0x188   : > { %v247_v27 = vpop.trf.xlu0 }
 0x189   : > { %280 = vst.msk [vmem:[%s631_s12 + $0xc0] sm:$0xff] %vm255_vm0, %v247_v27 }
 0x190   : > { %v248_v28 = vpop.trf.xlu0 }
 0x191   : > { %281 = vst.msk [vmem:[%s631_s12 + $0xc8] sm:$0xff] %vm255_vm0, %v248_v28 }
 0x198   : > { %v249_v29 = vpop.trf.xlu0 }
 0x199   : > { %282 = vst.msk [vmem:[%s631_s12 + $0xd0] sm:$0xff] %vm255_vm0, %v249_v29 }
 0x1a0   : > { %v250_v30 = vpop.trf.xlu0 }
 0x1a1   : > { %283 = vst.msk [vmem:[%s631_s12 + $0xd8] sm:$0xff] %vm255_vm0, %v250_v30 }
 0x1a8   : > { %v251_v31 = vpop.trf.xlu0 }
 0x1a9   : > { %284 = vst.msk [vmem:[%s631_s12 + $0xe0] sm:$0xff] %vm255_vm0, %v251_v31 }
 0x1b0   : > { %v252_v32 = vpop.trf.xlu0 }
 0x1b1   : > { %285 = vst.msk [vmem:[%s631_s12 + $0xe8] sm:$0xff] %vm255_vm0, %v252_v32 }
 0x1b8   : > { %v253_v33 = vpop.trf.xlu0 }
 0x1b9   : > { %286 = vst.msk [vmem:[%s631_s12 + $0xf0] sm:$0xff] %vm255_vm0, %v253_v33 }
 0x1c0   : > { %v254_v34 = vpop.trf.xlu0 }
 0x1c1   : > { %287 = vst.msk [vmem:[%s631_s12 + $0xf8] sm:$0xff] %vm255_vm0, %v254_v34 }
 0x1c2 PF: > { %s14_s11 = sadd.s32 1, %s549_s11   ;;  %s719_s6 = smov %s533_s7 }
 0x1c3   : > { %p11_p0 = scmp.ge.s32.totalorder %s14_s11, 4   ;;  %s720_s7 = smov %s537_s8 }
 0x1c4   : > { %s721_s8 = smov %s610_s18  ;;  %s722_s9 = smov %s545_s10 }
 0x1c5   : > { %s723_s10 = smov %s725_s13  ;;  %13 = sbr.rel (!%p11_p0) target bundleno = 4 (0x4), region = 64 }
 0x1ca   :  { %324 = vsyncpa [#allocation3], 1 }
 0x1cb   :  { %326 = vsyncpa [#allocation3 + $0x1], 1 }

</bundles_post_ra>
